<compile_context>
chip_gen: v5e
topology: v5e:2x2
jax: 0.10.0
libtpu: 0.0.40
codegen_flags: <defaults>
</compile_context>

<pallas_src>
import functools

import jax
import jax.numpy as jnp
from jax.experimental import pallas as pl
from jax.experimental.pallas import tpu as pltpu


def _round_up(n, m):
    return ((n + m - 1) // m) * m


# ---------------------------------------------------------------------------
# Pallas kernel: fused 4-layer MLP chain on one (features, TILE_B) batch tile.
# Activations are [features, batch]; weights are PyTorch-layout [out, in];
# biases are column vectors [out, 1] so they broadcast along lanes.
# ---------------------------------------------------------------------------
def svae_forward_kernel(xt_ref,
                        w1_ref, b1_ref,        # share_encoder hidden layer
                        w2_ref, b2_ref,        # share_encoder last layer (tanh)
                        wr1_ref, br1_ref,      # y_mean_regressor hidden layer
                        wr2_ref, br2_ref,      # y_mean_regressor last layer (no act)
                        out_ref):
    # Cast the streamed x tile to bf16 (no-op if already bf16) so the MXU runs at
    # native bf16 rate; accumulate in f32.
    x = xt_ref[...].astype(jnp.bfloat16)                       # (d_in, tb)

    # share_encoder: FC(share_dim, act=Tanh, output_act=Tanh).
    h = jnp.tanh(
        jnp.dot(w1_ref[...], x, preferred_element_type=jnp.float32) + b1_ref[...]
    )                                                           # (32, tb) f32
    h = jnp.tanh(
        jnp.dot(w2_ref[...], h.astype(jnp.bfloat16),
                preferred_element_type=jnp.float32) + b2_ref[...]
    )                                                           # (32, tb) f32

    # y_mean_regressor hidden: Linear + tanh.
    r = jnp.tanh(
        jnp.dot(wr1_ref[...], h.astype(jnp.bfloat16),
                preferred_element_type=jnp.float32) + br1_ref[...]
    )                                                           # (16, tb) f32

    # y_mean_regressor last layer (16 -> 1, no activation): an M=1 matmul would
    # waste the MXU, so compute it as a VPU multiply + cross-sublane reduction.
    # wr2 is stored as a (16, 1) f32 column.
    pred = jnp.sum(r * wr2_ref[...], axis=0, keepdims=True) + br2_ref[...]  # (1, tb)

    out_ref[...] = pred.astype(out_ref.dtype)                  # lane-dense store


# ---------------------------------------------------------------------------
# Wrapper: grid over batch (lane axis), weights pinned via constant index maps.
# ---------------------------------------------------------------------------
@functools.partial(jax.jit, static_argnames=("tile_b",))
def svae_forward(x, params, *, tile_b=512):
    B, d_in = x.shape

    # Batch tile is the lane dim of the block -> must be a multiple of 128.
    # Pick it large (>=512 when possible) to amortize the ~0.35us per-step
    # overhead; shrink to the 128-rounded batch for tiny demo batches.
    tb = min(_round_up(tile_b, 128), _round_up(B, 128))
    b_pad = _round_up(B, tb)
    num_tiles = b_pad // tb

    # Layout plumbing: present the batch on the lane axis ([features, batch]).
    xt = x.astype(jnp.bfloat16).T                       # (d_in, B)
    if b_pad != B:
        xt = jnp.pad(xt, ((0, 0), (0, b_pad - B)))

    w1, b1 = params["w1"], params["b1"]
    w2, b2 = params["w2"], params["b2"]
    wr1, br1 = params["wr1"], params["br1"]
    wr2, br2 = params["wr2_col"], params["br2"]

    def pinned(a):
        # Same block index every grid step -> fetched once, stays VMEM-resident.
        return pl.BlockSpec(a.shape, lambda i: (0, 0))

    out = pl.pallas_call(
        svae_forward_kernel,
        out_shape=jax.ShapeDtypeStruct((1, b_pad), jnp.float32),
        grid=(num_tiles,),
        in_specs=[
            pl.BlockSpec((d_in, tb), lambda i: (0, i)),   # streamed x tile
            pinned(w1), pinned(b1),
            pinned(w2), pinned(b2),
            pinned(wr1), pinned(br1),
            pinned(wr2), pinned(br2),
        ],
        out_specs=pl.BlockSpec((1, tb), lambda i: (0, i)),  # lane-dense output row
        compiler_params=pltpu.CompilerParams(
            dimension_semantics=("parallel",)),   # megacore sharding on v7x
    )(xt, w1, b1, w2, b2, wr1, br1, wr2, br2)

    # Back to the PyTorch-shaped (B, 1) prediction.
    return out.reshape(b_pad, 1)[:B]


# ---------------------------------------------------------------------------
# Deterministic parameter construction (mirrors FC.__init__ / _weight_initialization).
#   share_dim     = [16, 32, 32] -> Linear(16,32) [hidden], Linear(32,32) [last]
#   regressor_dim = [32, 16, 1]  -> Linear(32,16) [hidden], Linear(16,1)  [last]
# Tanh layers: xavier_uniform; no-activation last layer: xavier_normal; biases zero.
# Weights are kept in PyTorch [out, in] layout; biases as [out, 1] columns.
# ---------------------------------------------------------------------------
def xavier_uniform(key, fan_in, fan_out, dtype):
    bound = (6.0 / (fan_in + fan_out)) ** 0.5
    return jax.random.uniform(key, (fan_out, fan_in), jnp.float32,
                              -bound, bound).astype(dtype)


def xavier_normal(key, fan_in, fan_out, dtype):
    std = (2.0 / (fan_in + fan_out)) ** 0.5
    return (std * jax.random.normal(key, (fan_out, fan_in), jnp.float32)).astype(dtype)


def make_params(key, share_dim, regressor_dim):
    k1, k2, k3, k4 = jax.random.split(key, 4)
    return {
        # share_encoder (act=Tanh, output_act=Tanh): MXU operands in bf16.
        "w1": xavier_uniform(k1, share_dim[0], share_dim[1], jnp.bfloat16),   # (32,16)
        "b1": jnp.zeros((share_dim[1], 1), jnp.float32),
        "w2": xavier_uniform(k2, share_dim[1], share_dim[2], jnp.bfloat16),   # (32,32)
        "b2": jnp.zeros((share_dim[2], 1), jnp.float32),
        # y_mean_regressor hidden (act=Tanh).
        "wr1": xavier_uniform(k3, regressor_dim[0], regressor_dim[1], jnp.bfloat16),  # (16,32)
        "br1": jnp.zeros((regressor_dim[1], 1), jnp.float32),
        # y_mean_regressor last layer (output_act=None -> xavier_normal); stored as a
        # (16, 1) f32 column because the kernel applies it on the VPU/XLU, not the MXU.
        "wr2_col": xavier_normal(k4, regressor_dim[1], regressor_dim[2],
                                 jnp.float32).reshape(regressor_dim[1], 1),
        "br2": jnp.zeros((1, 1), jnp.float32),
    }


def svae_forward_reference(x, p):
    """Pure-JAX reference with the same bf16-operand / f32-accumulate numerics."""
    xb = x.astype(jnp.bfloat16)
    h = jnp.tanh(jnp.dot(xb, p["w1"].T,
                         preferred_element_type=jnp.float32) + p["b1"].T)
    h = jnp.tanh(jnp.dot(h.astype(jnp.bfloat16), p["w2"].T,
                         preferred_element_type=jnp.float32) + p["b2"].T)
    r = jnp.tanh(jnp.dot(h.astype(jnp.bfloat16), p["wr1"].T,
                         preferred_element_type=jnp.float32) + p["br1"].T)
    return jnp.dot(r, p["wr2_col"]) + p["br2"]


if __name__ == "__main__":
    share_dim = [16, 32, 32]
    encode_dim = [32, 16, 8]        # unused by forward (encoder branch not called)
    regressor_dim = [32, 16, 1]
    latentgen_dim = [4, 8]          # unused by forward

    key = jax.random.PRNGKey(0)
    kx, kp = jax.random.split(key)

    # Non-multiple-of-tile batch to exercise the padding path and a multi-step grid.
    B = 300
    x = jax.random.normal(kx, (B, share_dim[0]), jnp.float32).astype(jnp.bfloat16)
    params = make_params(kp, share_dim, regressor_dim)

    pred = svae_forward(x, params, tile_b=128)
    pred = jax.block_until_ready(pred)

    ref = svae_forward_reference(x, params)
    assert pred.shape == (B, 1)
    assert jnp.allclose(pred, ref, atol=5e-3, rtol=5e-3), float(
        jnp.max(jnp.abs(pred - ref)))

    print("KERNEL_OK")
</pallas_src>

<mosaic_0001>
module attributes {stable_mosaic.version = 11 : i64} {
  func.func @svae_forward_kernel(%arg0: i32, %arg1: memref<16x128xbf16, #tpu.memory_space<vmem>>, %arg2: memref<32x16xbf16, #tpu.memory_space<vmem>>, %arg3: memref<32x1xf32, #tpu.memory_space<vmem>>, %arg4: memref<32x32xbf16, #tpu.memory_space<vmem>>, %arg5: memref<32x1xf32, #tpu.memory_space<vmem>>, %arg6: memref<16x32xbf16, #tpu.memory_space<vmem>>, %arg7: memref<16x1xf32, #tpu.memory_space<vmem>>, %arg8: memref<16x1xf32, #tpu.memory_space<vmem>>, %arg9: memref<1x1xf32, #tpu.memory_space<vmem>>, %arg10: memref<1x128xf32, #tpu.memory_space<vmem>>) attributes {dimension_semantics = [#tpu.dimension_semantics<parallel>], iteration_bounds = array<i64: 3>, scalar_prefetch = 0 : i64, scratch_operands = 0 : i64, tpu.core_type = #tpu.core_type<tc>, window_params = [{transform_indices = @transform_0, window_bounds = array<i64: 16, 128>}, {pipeline_mode = #tpu.pipeline_mode<synchronous>, transform_indices = @transform_1, window_bounds = array<i64: 32, 16>}, {pipeline_mode = #tpu.pipeline_mode<synchronous>, transform_indices = @transform_2, window_bounds = array<i64: 32, 1>}, {pipeline_mode = #tpu.pipeline_mode<synchronous>, transform_indices = @transform_3, window_bounds = array<i64: 32, 32>}, {pipeline_mode = #tpu.pipeline_mode<synchronous>, transform_indices = @transform_4, window_bounds = array<i64: 32, 1>}, {pipeline_mode = #tpu.pipeline_mode<synchronous>, transform_indices = @transform_5, window_bounds = array<i64: 16, 32>}, {pipeline_mode = #tpu.pipeline_mode<synchronous>, transform_indices = @transform_6, window_bounds = array<i64: 16, 1>}, {pipeline_mode = #tpu.pipeline_mode<synchronous>, transform_indices = @transform_7, window_bounds = array<i64: 16, 1>}, {pipeline_mode = #tpu.pipeline_mode<synchronous>, transform_indices = @transform_8, window_bounds = array<i64: 1, 1>}, {transform_indices = @transform_9, window_bounds = array<i64: 1, 128>}]} {
    %c0 = arith.constant 0 : index
    %c0_0 = arith.constant 0 : index
    %0 = vector.load %arg1[%c0, %c0_0] : memref<16x128xbf16, #tpu.memory_space<vmem>>, vector<16x128xbf16>
    %c0_1 = arith.constant 0 : index
    %c0_2 = arith.constant 0 : index
    %1 = vector.load %arg2[%c0_1, %c0_2] : memref<32x16xbf16, #tpu.memory_space<vmem>>, vector<32x16xbf16>
    %cst = arith.constant dense<0.000000e+00> : vector<32x128xf32>
    %2 = tpu.matmul %1, %0, %cst {dimension_numbers = #tpu.dot_dimension_numbers<[1], [0], [0], [1], [0, 0, 1, 1], [], []>} : vector<32x16xbf16>, vector<16x128xbf16>, vector<32x128xf32> -> vector<32x128xf32>
    %c0_3 = arith.constant 0 : index
    %c0_4 = arith.constant 0 : index
    %3 = vector.load %arg3[%c0_3, %c0_4] : memref<32x1xf32, #tpu.memory_space<vmem>>, vector<32x1xf32>
    %4 = vector.broadcast %3 : vector<32x1xf32> to vector<32x128xf32>
    %5 = arith.addf %2, %4 : vector<32x128xf32>
    %6 = math.tanh %5 : vector<32x128xf32>
    %c0_5 = arith.constant 0 : index
    %c0_6 = arith.constant 0 : index
    %7 = vector.load %arg4[%c0_5, %c0_6] : memref<32x32xbf16, #tpu.memory_space<vmem>>, vector<32x32xbf16>
    %8 = arith.truncf %6 : vector<32x128xf32> to vector<32x128xbf16>
    %cst_7 = arith.constant dense<0.000000e+00> : vector<32x128xf32>
    %9 = tpu.matmul %7, %8, %cst_7 {dimension_numbers = #tpu.dot_dimension_numbers<[1], [0], [0], [1], [0, 0, 1, 1], [], []>} : vector<32x32xbf16>, vector<32x128xbf16>, vector<32x128xf32> -> vector<32x128xf32>
    %c0_8 = arith.constant 0 : index
    %c0_9 = arith.constant 0 : index
    %10 = vector.load %arg5[%c0_8, %c0_9] : memref<32x1xf32, #tpu.memory_space<vmem>>, vector<32x1xf32>
    %11 = vector.broadcast %10 : vector<32x1xf32> to vector<32x128xf32>
    %12 = arith.addf %9, %11 : vector<32x128xf32>
    %13 = math.tanh %12 : vector<32x128xf32>
    %c0_10 = arith.constant 0 : index
    %c0_11 = arith.constant 0 : index
    %14 = vector.load %arg6[%c0_10, %c0_11] : memref<16x32xbf16, #tpu.memory_space<vmem>>, vector<16x32xbf16>
    %15 = arith.truncf %13 : vector<32x128xf32> to vector<32x128xbf16>
    %cst_12 = arith.constant dense<0.000000e+00> : vector<16x128xf32>
    %16 = tpu.matmul %14, %15, %cst_12 {dimension_numbers = #tpu.dot_dimension_numbers<[1], [0], [0], [1], [0, 0, 1, 1], [], []>} : vector<16x32xbf16>, vector<32x128xbf16>, vector<16x128xf32> -> vector<16x128xf32>
    %c0_13 = arith.constant 0 : index
    %c0_14 = arith.constant 0 : index
    %17 = vector.load %arg7[%c0_13, %c0_14] : memref<16x1xf32, #tpu.memory_space<vmem>>, vector<16x1xf32>
    %18 = vector.broadcast %17 : vector<16x1xf32> to vector<16x128xf32>
    %19 = arith.addf %16, %18 : vector<16x128xf32>
    %20 = math.tanh %19 : vector<16x128xf32>
    %c0_15 = arith.constant 0 : index
    %c0_16 = arith.constant 0 : index
    %21 = vector.load %arg8[%c0_15, %c0_16] : memref<16x1xf32, #tpu.memory_space<vmem>>, vector<16x1xf32>
    %22 = vector.broadcast %21 : vector<16x1xf32> to vector<16x128xf32>
    %23 = arith.mulf %20, %22 : vector<16x128xf32>
    %cst_17 = arith.constant dense<0.000000e+00> : vector<128xf32>
    %24 = vector.multi_reduction <add>, %23, %cst_17 [0] : vector<16x128xf32> to vector<128xf32>
    %25 = vector.shape_cast %24 : vector<128xf32> to vector<1x128xf32>
    %c0_18 = arith.constant 0 : index
    %c0_19 = arith.constant 0 : index
    %26 = vector.load %arg9[%c0_18, %c0_19] : memref<1x1xf32, #tpu.memory_space<vmem>>, vector<1x1xf32>
    %27 = vector.broadcast %26 : vector<1x1xf32> to vector<1x128xf32>
    %28 = arith.addf %25, %27 : vector<1x128xf32>
    %c0_20 = arith.constant 0 : index
    %c0_21 = arith.constant 0 : index
    %29 = vector.load %arg10[%c0_20, %c0_21] : memref<1x128xf32, #tpu.memory_space<vmem>>, vector<1x128xf32>
    tpu.vector_store %arg10[%c0_20, %c0_21], %28 {strides = array<i32>} : memref<1x128xf32, #tpu.memory_space<vmem>>, vector<1x128xf32>,
    return
  }
  func.func @transform_0(%arg0: i32) -> (i32, i32) {
    %c0_i32 = arith.constant 0 : i32
    %c0_i32_0 = arith.constant 0 : i32
    return %c0_i32, %arg0 : i32, i32
  }
  func.func @transform_1(%arg0: i32) -> (i32, i32) {
    %c0_i32 = arith.constant 0 : i32
    %c0_i32_0 = arith.constant 0 : i32
    %c0_i32_1 = arith.constant 0 : i32
    return %c0_i32, %c0_i32_0 : i32, i32
  }
  func.func @transform_2(%arg0: i32) -> (i32, i32) {
    %c0_i32 = arith.constant 0 : i32
    %c0_i32_0 = arith.constant 0 : i32
    %c0_i32_1 = arith.constant 0 : i32
    return %c0_i32, %c0_i32_0 : i32, i32
  }
  func.func @transform_3(%arg0: i32) -> (i32, i32) {
    %c0_i32 = arith.constant 0 : i32
    %c0_i32_0 = arith.constant 0 : i32
    %c0_i32_1 = arith.constant 0 : i32
    return %c0_i32, %c0_i32_0 : i32, i32
  }
  func.func @transform_4(%arg0: i32) -> (i32, i32) {
    %c0_i32 = arith.constant 0 : i32
    %c0_i32_0 = arith.constant 0 : i32
    %c0_i32_1 = arith.constant 0 : i32
    return %c0_i32, %c0_i32_0 : i32, i32
  }
  func.func @transform_5(%arg0: i32) -> (i32, i32) {
    %c0_i32 = arith.constant 0 : i32
    %c0_i32_0 = arith.constant 0 : i32
    %c0_i32_1 = arith.constant 0 : i32
    return %c0_i32, %c0_i32_0 : i32, i32
  }
  func.func @transform_6(%arg0: i32) -> (i32, i32) {
    %c0_i32 = arith.constant 0 : i32
    %c0_i32_0 = arith.constant 0 : i32
    %c0_i32_1 = arith.constant 0 : i32
    return %c0_i32, %c0_i32_0 : i32, i32
  }
  func.func @transform_7(%arg0: i32) -> (i32, i32) {
    %c0_i32 = arith.constant 0 : i32
    %c0_i32_0 = arith.constant 0 : i32
    %c0_i32_1 = arith.constant 0 : i32
    return %c0_i32, %c0_i32_0 : i32, i32
  }
  func.func @transform_8(%arg0: i32) -> (i32, i32) {
    %c0_i32 = arith.constant 0 : i32
    %c0_i32_0 = arith.constant 0 : i32
    %c0_i32_1 = arith.constant 0 : i32
    return %c0_i32, %c0_i32_0 : i32, i32
  }
  func.func @transform_9(%arg0: i32) -> (i32, i32) {
    %c0_i32 = arith.constant 0 : i32
    %c0_i32_0 = arith.constant 0 : i32
    return %c0_i32, %arg0 : i32, i32
  }
}

</mosaic_0001>

<bundles_post_ra>
// kernel: svae_forward.1
= control target key start
LH: loop header
LB: loop body
LE: loop exit
PB: predicated region body
PF: predicated region fallthrough
CT: control target
= control target key end

     0   :  { %s929_s0 = inlined_call_operand.vmem [shape: bf16[16,384], index: 0, kind: input, shape index: {}]   ;;  %s930_s1 = inlined_call_operand.vmem [shape: bf16[32,16], index: 1, kind: input, shape index: {}]   ;;  %s931_s2 = inlined_call_operand.vmem [shape: f32[32,1], index: 2, kind: input, shape index: {}]   ;;  %s932_s3 = inlined_call_operand.vmem [shape: bf16[32,32], index: 3, kind: input, shape index: {}]   ;;  %s933_s4 = inlined_call_operand.vmem [shape: f32[32,1], index: 4, kind: input, shape index: {}]   ;;  %s934_s5 = inlined_call_operand.vmem [shape: bf16[16,32], index: 5, kind: input, shape index: {}]   ;;  %s935_s6 = inlined_call_operand.vmem [shape: f32[16,1], index: 6, kind: input, shape index: {}]   ;;  %s936_s7 = inlined_call_operand.vmem [shape: f32[16,1], index: 7, kind: input, shape index: {}]   ;;  %s937_s8 = inlined_call_operand.<no memory space> [shape: f32[1,1], index: 8, kind: input, shape index: {}]   ;;  %s938_s9 = inlined_call_operand.vmem [shape: f32[1,384], index: 9, kind: output, shape index: {}]  }
   0x1   :  { %v14_v0 = vstv %s937_s8 }
   0x2   :  { %15 = vst [vmem:[#allocation2] sm:$0x1] %v14_v0 }
   0x3   :  { %s821_s11 = smov 0   ;;  %s823_s12 = smov 0  }
   0x4   :  { %s825_s13 = smov 0  }
   0x5 LB: > { %s648_s8 = sadd.s32 4294967295, %s765_s13   ;;  %s838_s14 = sadd.s32 1, %s765_s13   ;;  %s765_s13 = sphi %s825_s13, %s941_s13   ;;  %s761_s12 = sphi %s823_s12, %s940_s12   ;;  %s757_s11 = sphi %s821_s11, %s939_s11  }
   0x6   : > { %s25_s15 = ssub.s32 %s765_s13, %s838_s14  ;;  %s28_s16 = sadd.s32 1, %s761_s12 }
   0x7   : > { %p26_p0 = scmp.eq.s32.totalorder %s25_s15, 0  ;;  %p35_p1 = scmp.ne.s32.totalorder %s761_s12, %s757_s11 }
   0x8   : > { %p36_p2 = scmp.eq.s32.totalorder %s765_s13, 0  ;;  %p651_p4 = scmp.ge.s32.totalorder %s765_s13, 3 }
   0x9   : > { %s847_s17 = scalar_select %p26_p0, %s761_s12, %s28_s16  }
   0xa   : > { %p37_p3 = por %p36_p2, %p35_p1  ;;  %279 = sbr.rel (%p651_p4) target bundleno = 21 (0x15), region = 48 }
   0xf   : > { %282 = sbr.rel (!%p37_p3) target bundleno = 21 (0x15), region = 52  ;;  %s284_s18 = sand.u32 (%p37_p3), 1, %s761_s12  }
  0x10   : > { %s653_s19 = sshll.u32 (%p37_p3), %s765_s13, 2  ;;  %s652_s20 = sshll.u32 (%p37_p3), %s284_s18, 3 }
  0x11   : > { %s288_s23 = scalar_lea.vmem (%p37_p3), %s929_s0, %s653_s19  ;;  %s286_s24 = scalar_lea.vmem (%p37_p3), [#allocation3], %s652_s20 }
  0x12   : > { %v305_v1 = vld [vmem:[%s288_s23] sm:$0xf] (%p37_p3)  ;;  %v307_v2 = vld [vmem:[%s288_s23 + $0xc] sm:$0xf] (%p37_p3) }
  0x13   : > { %306 = vst [vmem:[%s286_s24] sm:$0xf] (%p37_p3), %v305_v1 }
  0x14   : > { %308 = vst [vmem:[%s286_s24 + $0x4] sm:$0xf] %v307_v2 }
  0x15 PF: > { %p654_p5 = scmp.ge.s32.totalorder %s765_s13, 1  ;;  %p335_p6 = scmp.lt.s32.totalorder %s765_s13, 4 }
  0x17   : > { %p336_p7 = pnand %p654_p5, %p335_p6 }
  0x18   : > { %s342_s27 = sand.u32 (!%p336_p7), 1, %s757_s11   ;;  %p375_p8 = scmp.lt.s32.totalorder (!%p336_p7), %s648_s8, 2 }
  0x19   : > { %339 = sbr.rel (%p336_p7) target bundleno = 530 (0x212), region = 93  ;;  %s655_s28 = sshll.u32 (!%p336_p7), %s342_s27, 3 }
  0x1a   : > { %s344_s10 = scalar_lea.vmem (!%p336_p7), [#allocation3], %s655_s28 }
  0x1e   : > { %v387_v3 = vld [vmem:[%s931_s2 + $0x10] sm:$0xff]  ;;  %v767_v4 = vmov 0   ;;  %v385_v5 = vld [vmem:[%s931_s2] sm:$0xff]  ;;  %vm425_vm0 = vcmask 130048   ;;  %v388_v8 = vld [vmem:[%s931_s2 + $0x18] sm:$0xff]  ;;  %vm495_vm1 = vcmask 261120  }
  0x1f   : > { %720 = vset.pattern.permute.xlu0 %v767_v4  ;;  %721 = vset.pattern.permute.xlu1 %v767_v4  ;;  %v687_v6 = vld [vmem:[%s344_s10] sm:$0xff]  ;;  %v586_v15 = vld [vmem:[#allocation2] sm:$0x1]  ;;  %v464_v22 = vld [vmem:[%s933_s4 + $0x18] sm:$0xff]  ;;  %s943_s8 = smov (!%p375_p8, %s648_s8), 2 }
  0x20   : > { %401 = vperm.xlu0 %720, %v387_v3   ;;  %391 = vperm.xlu1 %721, %v385_v5   ;;  %v688_v7 = vld [vmem:[%s930_s1] sm:$0xff]  ;;  %v386_v9 = vld [vmem:[%s931_s2 + $0x8] sm:$0xff]  ;;  %v463_v18 = vld [vmem:[%s933_s4 + $0x10] sm:$0xff]  ;;  %s377_s30 = scalar_lea.vmem %s938_s9, %s943_s8 }
  0x21   : > { %722 = vset.pattern.permute.xlu2 %v767_v4  ;;  %439 = vmatpush.bf16.msra.mxu0 %v687_v6  ;;  %v461_v10 = vld [vmem:[%s933_s4] sm:$0xff]  ;;  %v462_v11 = vld [vmem:[%s933_s4 + $0x8] sm:$0xff] }
  0x22   : > { %v689_v12 = vld [vmem:[%s930_s1 + $0x8] sm:$0xff]  ;;  %v565_v14 = vld [vmem:[%s936_s7] sm:$0xff]  ;;  %477 = vperm.xlu2 %722, %v463_v18  }
  0x23   : > { %v530_v13 = vld [vmem:[%s935_s6 + $0x8] sm:$0xff]  ;;  %v529_v29 = vld [vmem:[%s935_s6] sm:$0xff] }
  0x24   : > { %668 = vmatmul.msk.bf16.vlgmr.msra.gmra.mxu0 %vm425_vm0, %v688_v7  ;;  %v566_v34 = vld [vmem:[%s936_s7 + $0x8] sm:$0xff]  ;;  %v690_v38 = vld [vmem:[%s932_s3] sm:$0xff] }
  0x25   : > { %v691_v39 = vld [vmem:[%s932_s3 + $0x8] sm:$0xff]  ;;  %v692_v58 = vld [vmem:[%s934_s5] sm:$0xff] }
  0x28   : > { %406 = vperm.xlu0 %720, %v388_v8   ;;  %396 = vperm.xlu1 %721, %v386_v9  }
  0x2a   : > { %482 = vperm.xlu2 %722, %v464_v22  }
  0x30   : > { %467 = vperm.xlu0 %720, %v461_v10   ;;  %472 = vperm.xlu1 %721, %v462_v11  }
  0x32   : > { %533 = vperm.xlu2 %722, %v529_v29  }
  0x34   : > { %669 = vmatmul.msk.bf16.gmra.mxu0 %vm425_vm0, %v689_v12 }
  0x38   : > { %538 = vperm.xlu0 %720, %v530_v13   ;;  %569 = vperm.xlu1 %721, %v565_v14  }
  0x3a   : > { %574 = vperm.xlu2 %722, %v566_v34  }
  0x40   : > { %589 = vperm.xlu0 %720, %v586_v15  }
  0x7c   : > { %v478_v41 = vpop.permute.xlu2 %477 }
  0x84   : > { %v483_v46 = vpop.permute.xlu2 %482 }
  0x8c   : > { %v534_v60 = vpop.permute.xlu2 %533 }
  0x92   : > { %v402_v19 = vpop.permute.xlu0 %401  ;;  %v392_v20 = vpop.permute.xlu1 %391 }
  0x94   : > { %v575_v4 = vpop.permute.xlu2 %574 }
  0x9a   : > { %v407_v24 = vpop.permute.xlu0 %406  ;;  %v397_v25 = vpop.permute.xlu1 %396 }
  0xa1   : > { %v441_v16 = vpop.f32.mrf.mxu0 }
  0xa2   : > { %v442_v30 = vadd.f32 %v441_v16, %v392_v20  ;;  %v473_v45 = vpop.permute.xlu1 %472  ;;  %v468_v50 = vpop.permute.xlu0 %467 }
  0xa9   : > { %v443_v17 = vpop.f32.mrf.mxu0 }
  0xaa   : > { %v444_v27 = vadd.f32 %v443_v17, %v397_v25  ;;  %v539_v62 = vpop.permute.xlu0 %538  ;;  %v570_v3 = vpop.permute.xlu1 %569 }
  0xb1   : > { %v446_v21 = vpop.f32.mrf.mxu0 }
  0xb2   : > { %v447_v23 = vadd.f32 %v446_v21, %v402_v19  ;;  %v590_v12 = vpop.permute.xlu0 %589 }
  0xb3   : > { %v592_v14 = vperm.slane %v590_v12, 0 }
  0xb4   : > { %723 = vtanh.f32 %v447_v23 }
  0xb9   : > { %v448_v26 = vpop.f32.mrf.mxu0 }
  0xba   : > { %v449_v28 = vadd.f32 %v448_v26, %v407_v24  ;;  %v724_v31 = vpop.eup %723 }
  0xbc   : > { %725 = vtanh.f32 %v449_v28 }
  0xbd   : > { %727 = vtanh.f32 %v444_v27 }
  0xbe   : > { %729 = vtanh.f32 %v442_v30 }
  0xc2   : > { %v726_v32 = vpop.eup %725 }
  0xc3   : > { %v460_v33 = vpack.c.bf16 %v726_v32, %v724_v31  ;;  %v728_v35 = vpop.eup %727 }
  0xc4   : > { %v730_v36 = vpop.eup %729 }
  0xc5   : > { %508 = vmatpush.bf16.msra.mxu1 %v460_v33  ;;  %693 = vmatpush.bf16.msra.mxu3 %v460_v33  ;;  %v459_v37 = vpack.c.bf16 %v728_v35, %v730_v36 }
  0xc9   : > { %509 = vmatpush.bf16.msra.mxu1 %v459_v37  ;;  %694 = vmatpush.bf16.msra.mxu3 %v459_v37 }
  0xcc   : > { %678 = vmatmul.msk.bf16.vlgmr.msra.gmra.mxu1 %vm495_vm1, %v690_v38  ;;  %679 = vmatmul.msk.bf16.vlgmr.msra.gmra.mxu3 %vm495_vm1, %v691_v39 }
 0x149   : > { %v511_v40 = vpop.f32.mrf.mxu1 }
 0x14a   : > { %v512_v51 = vadd.f32 %v511_v40, %v468_v50 }
 0x14f   : > { %v516_v42 = vpop.f32.mrf.mxu3 }
 0x150   : > { %v517_v43 = vadd.f32 %v516_v42, %v478_v41 }
 0x151   : > { %v513_v44 = vpop.f32.mrf.mxu1 }
 0x152   : > { %v514_v48 = vadd.f32 %v513_v44, %v473_v45  ;;  %731 = vtanh.f32 %v517_v43 }
 0x157   : > { %v518_v47 = vpop.f32.mrf.mxu3 }
 0x158   : > { %v519_v49 = vadd.f32 %v518_v47, %v483_v46  ;;  %v732_v52 = vpop.eup %731 }
 0x15a   : > { %733 = vtanh.f32 %v519_v49 }
 0x15b   : > { %735 = vtanh.f32 %v514_v48 }
 0x15c   : > { %737 = vtanh.f32 %v512_v51 }
 0x160   : > { %v734_v53 = vpop.eup %733 }
 0x161   : > { %v528_v54 = vpack.c.bf16 %v734_v53, %v732_v52  ;;  %v736_v55 = vpop.eup %735 }
 0x162   : > { %v738_v56 = vpop.eup %737 }
 0x163   : > { %555 = vmatpush.bf16.msra.mxu2 %v528_v54  ;;  %v527_v57 = vpack.c.bf16 %v736_v55, %v738_v56 }
 0x167   : > { %556 = vmatpush.bf16.msra.mxu2 %v527_v57 }
 0x16a   : > { %684 = vmatmul.msk.bf16.vlgmr.msra.gmra.mxu2 %vm495_vm1, %v692_v58 }
 0x1ed   : > { %v558_v59 = vpop.f32.mrf.mxu2 }
 0x1ee   : > { %v559_v61 = vadd.f32 %v558_v59, %v534_v60 }
 0x1f0   : > { %739 = vtanh.f32 %v559_v61 }
 0x1f5   : > { %v560_v63 = vpop.f32.mrf.mxu2 }
 0x1f6   : > { %v561_v0 = vadd.f32 %v560_v63, %v539_v62  ;;  %v740_v1 = vpop.eup %739 }
 0x1f7   : > { %v577_v5 = vmul.f32 %v740_v1, %v570_v3 }
 0x1f8   : > { %741 = vtanh.f32 %v561_v0 }
 0x1fe   : > { %v742_v2 = vpop.eup %741 }
 0x1ff   : > { %v578_v6 = vmul.f32 %v742_v2, %v575_v4 }
 0x201   : > { %v579_v7 = vadd.f32 %v578_v6, %v577_v5 }
 0x203   : > { %v580_v8 = vrot.slane %v579_v7, 4 }
 0x205   : > { %v581_v9 = vadd.f32 %v580_v8, %v579_v7 }
 0x207   : > { %v582_v10 = vrot.slane %v581_v9, 2 }
 0x209   : > { %v583_v11 = vadd.f32 %v582_v10, %v581_v9 }
 0x20b   : > { %v584_v13 = vrot.slane %v583_v11, 1 }
 0x20d   : > { %v585_v15 = vadd.f32 %v584_v13, %v583_v11 }
 0x20f   : > { %v593_v16 = vadd.f32 %v592_v14, %v585_v15 }
 0x211   : > { %594 = vst [vmem:[%s377_s30] sm:$0x1] %v593_v16 }
 0x212 PF: > { %p18_p9 = scmp.ge.s32.totalorder %s838_s14, 5   ;;  %s939_s11 = smov %s761_s12 }
 0x213   : > { %s940_s12 = smov %s847_s17  ;;  %s941_s13 = smov %s838_s14 }
 0x214   :  { %20 = sbr.rel (!%p18_p9) target bundleno = 5 (0x5), region = 132 }

</bundles_post_ra>
